<compile_context>
chip_gen: v7x
topology: tpu7x:2x2x1
jax: 0.10.0
libtpu: 0.0.40
codegen_flags: <defaults>
</compile_context>

<pallas_src>
import jax
import jax.numpy as jnp
from jax.experimental import pallas as pl
from jax.experimental.pallas import tpu as pltpu


def _round_up(a, b):
    return (a + b - 1) // b * b


def _vocab_proj_kernel(inv_temp_ref, x_ref, wffn_ref, bffn_ref, watt_ref, e_ref,
                       o_ref, ffn_sc, m_sc, l_sc, acc_sc):
    h = pl.program_id(0)
    v = pl.program_id(2)
    nv = pl.num_programs(2)

    @pl.when(v == 0)
    def _init():
        # Per-head channel FFN (Linear with bias), computed once per (head, token tile).
        ffn = jnp.dot(x_ref[...], wffn_ref[...],
                      preferred_element_type=jnp.float32) + bffn_ref[...]
        ffn_sc[...] = ffn.astype(ffn_sc.dtype)
        m_sc[...] = jnp.full_like(m_sc, -jnp.inf)
        l_sc[...] = jnp.zeros_like(l_sc)
        acc_sc[...] = jnp.zeros_like(acc_sc)

    # Vocab-attention logits for this vocab chunk; temperature folded in as a multiply.
    inv_t = inv_temp_ref[h]
    s = jnp.dot(ffn_sc[...], watt_ref[...],
                preferred_element_type=jnp.float32) * inv_t            # (tm, tv) f32

    # Online (flash-style) softmax reduction over the vocab axis.
    m_new = jnp.maximum(m_sc[...], jnp.max(s, axis=-1, keepdims=True))
    alpha = jnp.exp(m_sc[...] - m_new)
    p = jnp.exp(s - m_new)
    l_sc[...] = alpha * l_sc[...] + jnp.sum(p, axis=-1, keepdims=True)
    acc_sc[...] = alpha * acc_sc[...] + jnp.dot(
        p.astype(e_ref.dtype), e_ref[...], preferred_element_type=jnp.float32)
    m_sc[...] = m_new

    @pl.when(v == nv - 1)
    def _finalize():
        o_ref[...] = (acc_sc[...] *
                      pl.reciprocal(l_sc[...], approx=True)).astype(o_ref.dtype)


def vocab_projection_ffn(x, params, *, tm=256, tv=512, compute_dtype=jnp.bfloat16):
    """x: (B, T, n_embd). Returns (B, T, n_embd) in x.dtype (eval-mode forward)."""
    B, T, C = x.shape
    n_head, hd, _ = params["w_ffn_t"].shape
    V = params["e"].shape[0]
    assert C == n_head * hd, "n_embd must equal n_head * head_dim"
    N = B * T

    # Token tile: fixed (default 256) so the token axis pipelines; pad rows to a multiple.
    tm = min(tm, _round_up(N, 8))
    assert tm % 8 == 0
    n_pad = _round_up(N, tm)

    # Vocab tile: lane-aligned divisor of V (online softmax iterates over it).
    tv = min(tv, V)
    assert V % tv == 0 and tv % 128 == 0, "vocab tile must divide V and be a multiple of 128"

    # Pre-invert the clamped temperature so the kernel multiplies instead of dividing.
    inv_temps = (1.0 / jnp.clip(params["temps"], 0.1, None)).astype(jnp.float32)

    # Head-major, per-head-contiguous layouts; matmul operands cast to bf16 for the MXU.
    x_hm = x.reshape(N, n_head, hd)
    if n_pad != N:
        x_hm = jnp.pad(x_hm, ((0, n_pad - N), (0, 0), (0, 0)))
    x_hm = jnp.transpose(x_hm, (1, 0, 2)).astype(compute_dtype)                 # (H, Np, hd)
    e_hm = jnp.transpose(params["e"].reshape(V, n_head, hd),
                         (1, 0, 2)).astype(compute_dtype)                       # (H, V, hd)
    w_ffn = params["w_ffn_t"].astype(compute_dtype)                             # (H, hd, hd)
    w_att = params["w_att_t"].astype(compute_dtype)                             # (H, hd, V)
    b_ffn = params["b_ffn"].reshape(n_head, 1, hd).astype(jnp.float32)          # (H, 1, hd)

    grid = (n_head, n_pad // tm, V // tv)

    out = pl.pallas_call(
        _vocab_proj_kernel,
        out_shape=jax.ShapeDtypeStruct((n_head, n_pad, hd), x.dtype),
        grid_spec=pltpu.PrefetchScalarGridSpec(
            num_scalar_prefetch=0,
            grid=grid,
            in_specs=[
                # 1/clamp(temperature): tiny, lives whole in SMEM.
                pl.BlockSpec(memory_space=pltpu.MemorySpace.SMEM),
                # x: per-head token tile (invariant over the vocab axis -> no re-DMA).
                pl.BlockSpec((None, tm, hd), lambda h, i, v: (h, i, 0)),
                # W_ffn^T: per-head, fetched once per head.
                pl.BlockSpec((None, hd, hd), lambda h, i, v: (h, 0, 0)),
                # b_ffn: per-head static block (no dynamic sublane indexing in-kernel).
                pl.BlockSpec((None, 1, hd), lambda h, i, v: (h, 0, 0)),
                # W_att^T: per-head, tiled over the vocab axis.
                pl.BlockSpec((None, hd, tv), lambda h, i, v: (h, 0, v)),
                # E (head-major): per-head, tiled over the vocab axis, contiguous DMA.
                pl.BlockSpec((None, tv, hd), lambda h, i, v: (h, v, 0)),
            ],
            out_specs=pl.BlockSpec((None, tm, hd), lambda h, i, v: (h, i, 0)),
            scratch_shapes=[
                pltpu.VMEM((tm, hd), compute_dtype),   # ffn activations (reused over vocab chunks)
                pltpu.VMEM((tm, 1), jnp.float32),      # running max
                pltpu.VMEM((tm, 1), jnp.float32),      # running sum
                pltpu.VMEM((tm, hd), jnp.float32),     # output accumulator
            ]),
        compiler_params=pltpu.CompilerParams(
            dimension_semantics=("parallel", "parallel", "arbitrary"),
            # Explicit scoped-VMEM budget: above the 16/32 MiB defaults, safely under
            # v7x's 64 MiB physical VMEM.
            vmem_limit_bytes=48 * 1024 * 1024),
    )(inv_temps, x_hm, w_ffn, b_ffn, w_att, e_hm)

    out = jnp.transpose(out, (1, 0, 2))[:N].reshape(B, T, C)
    return out


def reference(x, params, compute_dtype=jnp.float32):
    """Pure-JAX reference mirroring the PyTorch forward (eval mode).

    `compute_dtype` casts the matmul operands the same way the kernel does, so the
    comparison isolates kernel bugs rather than bf16 rounding.
    """
    B, T, C = x.shape
    n_head, hd, _ = params["w_ffn_t"].shape
    xc = x.reshape(B, T, n_head, hd)
    outs = []
    for h in range(n_head):
        x_h = xc[:, :, h, :].astype(compute_dtype)
        w_ffn = params["w_ffn_t"][h].astype(compute_dtype)
        ffn_h = jnp.dot(x_h, w_ffn, preferred_element_type=jnp.float32) + params["b_ffn"][h]
        w_att = params["w_att_t"][h].astype(compute_dtype)
        logits_h = jnp.dot(ffn_h.astype(compute_dtype), w_att,
                           preferred_element_type=jnp.float32)
        inv_t = 1.0 / jnp.clip(params["temps"][h], 0.1, None)
        w_h = jax.nn.softmax(logits_h * inv_t, axis=-1)
        e_h = params["e"][:, h * hd:(h + 1) * hd].astype(compute_dtype)
        outs.append(jnp.dot(w_h.astype(compute_dtype), e_h,
                            preferred_element_type=jnp.float32))
    return jnp.stack(outs, axis=2).reshape(B, T, C)


def init_params(key, *, vocab_size, n_embd, n_head):
    hd = n_embd // n_head
    k = jax.random.split(key, 5)
    return {
        # nn.Linear(head_dim, head_dim, bias=True) weights, stored transposed & head-stacked
        "w_ffn_t": 0.02 * jax.random.normal(k[0], (n_head, hd, hd), jnp.float32),
        "b_ffn": 0.02 * jax.random.normal(k[1], (n_head, hd), jnp.float32),
        # nn.Linear(head_dim, vocab_size, bias=False) weights, transposed & head-stacked
        "w_att_t": 0.02 * jax.random.normal(k[2], (n_head, hd, vocab_size), jnp.float32),
        # channel temperatures (torch.ones(n_head) init)
        "temps": jnp.ones((n_head,), jnp.float32),
        # vocabulary embedding table (vocab_size, n_embd)
        "e": 0.02 * jax.random.normal(k[3], (vocab_size, n_embd), jnp.float32),
    }


if __name__ == "__main__":
    # Small config chosen so the test exercises every code path:
    #   2 heads x 3 token tiles x 2 vocab chunks, including token-row padding (N=22 -> 24).
    B, T = 2, 11
    n_head = 2
    head_dim = 128
    n_embd = n_head * head_dim      # 256
    vocab_size = 256

    key = jax.random.PRNGKey(0)
    k_x, k_p = jax.random.split(key)
    params = init_params(k_p, vocab_size=vocab_size, n_embd=n_embd, n_head=n_head)
    x = jax.random.normal(k_x, (B, T, n_embd), jnp.float32)

    out = vocab_projection_ffn(x, params, tm=8, tv=128, compute_dtype=jnp.bfloat16)
    out = jax.block_until_ready(out)

    ref = jax.block_until_ready(reference(x, params, compute_dtype=jnp.bfloat16))
    assert out.shape == (B, T, n_embd)
    err = jnp.max(jnp.abs(out - ref))
    assert jnp.allclose(out, ref, atol=2e-4, rtol=2e-2), f"max abs err {err}"

    print("KERNEL_OK")
</pallas_src>

<mosaic_0001>
module attributes {stable_mosaic.version = 11 : i64} {
  func.func @_vocab_proj_kernel(%arg0: i32, %arg1: i32, %arg2: i32, %arg3: memref<2xf32, #tpu.memory_space<smem>>, %arg4: memref<1x8x128xbf16, #tpu.memory_space<vmem>>, %arg5: memref<1x128x128xbf16, #tpu.memory_space<vmem>>, %arg6: memref<1x1x128xf32, #tpu.memory_space<vmem>>, %arg7: memref<1x128x128xbf16, #tpu.memory_space<vmem>>, %arg8: memref<1x128x128xbf16, #tpu.memory_space<vmem>>, %arg9: memref<1x8x128xf32, #tpu.memory_space<vmem>>, %arg10: memref<8x128xbf16, #tpu.memory_space<vmem>>, %arg11: memref<8x1xf32, #tpu.memory_space<vmem>>, %arg12: memref<8x1xf32, #tpu.memory_space<vmem>>, %arg13: memref<8x128xf32, #tpu.memory_space<vmem>>) attributes {dimension_semantics = [#tpu.dimension_semantics<parallel>, #tpu.dimension_semantics<parallel>, #tpu.dimension_semantics<arbitrary>], iteration_bounds = array<i64: 2, 3, 2>, scalar_prefetch = 0 : i64, scratch_operands = 4 : i64, tpu.core_type = #tpu.core_type<tc>, window_params = [{transform_indices = @transform_0, window_bounds = array<i64: 2>}, {transform_indices = @transform_1, window_bounds = array<i64: 1, 8, 128>}, {transform_indices = @transform_2, window_bounds = array<i64: 1, 128, 128>}, {transform_indices = @transform_3, window_bounds = array<i64: 1, 1, 128>}, {transform_indices = @transform_4, window_bounds = array<i64: 1, 128, 128>}, {transform_indices = @transform_5, window_bounds = array<i64: 1, 128, 128>}, {transform_indices = @transform_6, window_bounds = array<i64: 1, 8, 128>}]} {
    %c0_i32 = arith.constant 0 : i32
    %0 = arith.cmpi eq, %arg2, %c0_i32 : i32
    %1 = arith.extui %0 : i1 to i32
    %c0_i32_0 = arith.constant 0 : i32
    %2 = arith.cmpi ne, %1, %c0_i32_0 : i32
    scf.if %2 {
      %c0_26 = arith.constant 0 : index
      %c0_27 = arith.constant 0 : index
      %c0_28 = arith.constant 0 : index
      %40 = vector.load %arg4[%c0_26, %c0_27, %c0_28] : memref<1x8x128xbf16, #tpu.memory_space<vmem>>, vector<1x8x128xbf16>
      %41 = vector.shape_cast %40 : vector<1x8x128xbf16> to vector<8x128xbf16>
      %c0_29 = arith.constant 0 : index
      %c0_30 = arith.constant 0 : index
      %c0_31 = arith.constant 0 : index
      %42 = vector.load %arg5[%c0_29, %c0_30, %c0_31] : memref<1x128x128xbf16, #tpu.memory_space<vmem>>, vector<1x128x128xbf16>
      %43 = vector.shape_cast %42 : vector<1x128x128xbf16> to vector<128x128xbf16>
      %cst_32 = arith.constant dense<0.000000e+00> : vector<8x128xf32>
      %44 = tpu.matmul %41, %43, %cst_32 {dimension_numbers = #tpu.dot_dimension_numbers<[1], [0], [0], [1], [0, 0, 1, 1], [], []>} : vector<8x128xbf16>, vector<128x128xbf16>, vector<8x128xf32> -> vector<8x128xf32>
      %c0_33 = arith.constant 0 : index
      %c0_34 = arith.constant 0 : index
      %c0_35 = arith.constant 0 : index
      %45 = vector.load %arg6[%c0_33, %c0_34, %c0_35] : memref<1x1x128xf32, #tpu.memory_space<vmem>>, vector<1x1x128xf32>
      %46 = vector.shape_cast %45 : vector<1x1x128xf32> to vector<1x128xf32>
      %47 = vector.broadcast %46 : vector<1x128xf32> to vector<8x128xf32>
      %48 = arith.addf %44, %47 : vector<8x128xf32>
      %49 = arith.truncf %48 : vector<8x128xf32> to vector<8x128xbf16>
      %c0_36 = arith.constant 0 : index
      %c0_37 = arith.constant 0 : index
      %50 = vector.load %arg10[%c0_36, %c0_37] : memref<8x128xbf16, #tpu.memory_space<vmem>>, vector<8x128xbf16>
      tpu.vector_store %arg10[%c0_36, %c0_37], %49 {strides = array<i32>} : memref<8x128xbf16, #tpu.memory_space<vmem>>, vector<8x128xbf16>,
      %cst_38 = arith.constant 0xFF800000 : f32
      %51 = vector.broadcast %cst_38 : f32 to vector<8x1xf32>
      %c0_39 = arith.constant 0 : index
      %c0_40 = arith.constant 0 : index
      %52 = vector.load %arg11[%c0_39, %c0_40] : memref<8x1xf32, #tpu.memory_space<vmem>>, vector<8x1xf32>
      tpu.vector_store %arg11[%c0_39, %c0_40], %51 {strides = array<i32>} : memref<8x1xf32, #tpu.memory_space<vmem>>, vector<8x1xf32>,
      %cst_41 = arith.constant 0.000000e+00 : f32
      %53 = vector.broadcast %cst_41 : f32 to vector<8x1xf32>
      %c0_42 = arith.constant 0 : index
      %c0_43 = arith.constant 0 : index
      %54 = vector.load %arg12[%c0_42, %c0_43] : memref<8x1xf32, #tpu.memory_space<vmem>>, vector<8x1xf32>
      tpu.vector_store %arg12[%c0_42, %c0_43], %53 {strides = array<i32>} : memref<8x1xf32, #tpu.memory_space<vmem>>, vector<8x1xf32>,
      %cst_44 = arith.constant 0.000000e+00 : f32
      %55 = vector.broadcast %cst_44 : f32 to vector<8x128xf32>
      %c0_45 = arith.constant 0 : index
      %c0_46 = arith.constant 0 : index
      %56 = vector.load %arg13[%c0_45, %c0_46] : memref<8x128xf32, #tpu.memory_space<vmem>>, vector<8x128xf32>
      tpu.vector_store %arg13[%c0_45, %c0_46], %55 {strides = array<i32>} : memref<8x128xf32, #tpu.memory_space<vmem>>, vector<8x128xf32>,
    } else {
    }
    %3 = arith.index_cast %arg0 : i32 to index
    %4 = memref.load %arg3[%3] : memref<2xf32, #tpu.memory_space<smem>>
    %c0 = arith.constant 0 : index
    %c0_1 = arith.constant 0 : index
    %5 = vector.load %arg10[%c0, %c0_1] : memref<8x128xbf16, #tpu.memory_space<vmem>>, vector<8x128xbf16>
    %c0_2 = arith.constant 0 : index
    %c0_3 = arith.constant 0 : index
    %c0_4 = arith.constant 0 : index
    %6 = vector.load %arg7[%c0_2, %c0_3, %c0_4] : memref<1x128x128xbf16, #tpu.memory_space<vmem>>, vector<1x128x128xbf16>
    %7 = vector.shape_cast %6 : vector<1x128x128xbf16> to vector<128x128xbf16>
    %cst = arith.constant dense<0.000000e+00> : vector<8x128xf32>
    %8 = tpu.matmul %5, %7, %cst {dimension_numbers = #tpu.dot_dimension_numbers<[1], [0], [0], [1], [0, 0, 1, 1], [], []>} : vector<8x128xbf16>, vector<128x128xbf16>, vector<8x128xf32> -> vector<8x128xf32>
    %9 = vector.broadcast %4 : f32 to vector<8x128xf32>
    %10 = arith.mulf %8, %9 : vector<8x128xf32>
    %c0_5 = arith.constant 0 : index
    %c0_6 = arith.constant 0 : index
    %11 = vector.load %arg11[%c0_5, %c0_6] : memref<8x1xf32, #tpu.memory_space<vmem>>, vector<8x1xf32>
    %cst_7 = arith.constant dense<0xFF800000> : vector<8xf32>
    %12 = vector.multi_reduction <maximumf>, %10, %cst_7 [1] : vector<8x128xf32> to vector<8xf32>
    %13 = vector.shape_cast %12 : vector<8xf32> to vector<8x1xf32>
    %14 = arith.maximumf %11, %13 : vector<8x1xf32>
    %c0_8 = arith.constant 0 : index
    %c0_9 = arith.constant 0 : index
    %15 = vector.load %arg11[%c0_8, %c0_9] : memref<8x1xf32, #tpu.memory_space<vmem>>, vector<8x1xf32>
    %16 = arith.subf %15, %14 : vector<8x1xf32>
    %17 = math.exp %16 : vector<8x1xf32>
    %18 = vector.broadcast %14 : vector<8x1xf32> to vector<8x128xf32>
    %19 = arith.subf %10, %18 : vector<8x128xf32>
    %20 = math.exp %19 : vector<8x128xf32>
    %c0_10 = arith.constant 0 : index
    %c0_11 = arith.constant 0 : index
    %21 = vector.load %arg12[%c0_10, %c0_11] : memref<8x1xf32, #tpu.memory_space<vmem>>, vector<8x1xf32>
    %22 = arith.mulf %17, %21 : vector<8x1xf32>
    %cst_12 = arith.constant dense<0.000000e+00> : vector<8xf32>
    %23 = vector.multi_reduction <add>, %20, %cst_12 [1] : vector<8x128xf32> to vector<8xf32>
    %24 = vector.shape_cast %23 : vector<8xf32> to vector<8x1xf32>
    %25 = arith.addf %22, %24 : vector<8x1xf32>
    %c0_13 = arith.constant 0 : index
    %c0_14 = arith.constant 0 : index
    %26 = vector.load %arg12[%c0_13, %c0_14] : memref<8x1xf32, #tpu.memory_space<vmem>>, vector<8x1xf32>
    tpu.vector_store %arg12[%c0_13, %c0_14], %25 {strides = array<i32>} : memref<8x1xf32, #tpu.memory_space<vmem>>, vector<8x1xf32>,
    %c0_15 = arith.constant 0 : index
    %c0_16 = arith.constant 0 : index
    %27 = vector.load %arg13[%c0_15, %c0_16] : memref<8x128xf32, #tpu.memory_space<vmem>>, vector<8x128xf32>
    %28 = vector.broadcast %17 : vector<8x1xf32> to vector<8x128xf32>
    %29 = arith.mulf %28, %27 : vector<8x128xf32>
    %30 = arith.truncf %20 : vector<8x128xf32> to vector<8x128xbf16>
    %c0_17 = arith.constant 0 : index
    %c0_18 = arith.constant 0 : index
    %c0_19 = arith.constant 0 : index
    %31 = vector.load %arg8[%c0_17, %c0_18, %c0_19] : memref<1x128x128xbf16, #tpu.memory_space<vmem>>, vector<1x128x128xbf16>
    %32 = vector.shape_cast %31 : vector<1x128x128xbf16> to vector<128x128xbf16>
    %cst_20 = arith.constant dense<0.000000e+00> : vector<8x128xf32>
    %33 = tpu.matmul %30, %32, %cst_20 {dimension_numbers = #tpu.dot_dimension_numbers<[1], [0], [0], [1], [0, 0, 1, 1], [], []>} : vector<8x128xbf16>, vector<128x128xbf16>, vector<8x128xf32> -> vector<8x128xf32>
    %34 = arith.addf %29, %33 : vector<8x128xf32>
    %c0_21 = arith.constant 0 : index
    %c0_22 = arith.constant 0 : index
    %35 = vector.load %arg13[%c0_21, %c0_22] : memref<8x128xf32, #tpu.memory_space<vmem>>, vector<8x128xf32>
    tpu.vector_store %arg13[%c0_21, %c0_22], %34 {strides = array<i32>} : memref<8x128xf32, #tpu.memory_space<vmem>>, vector<8x128xf32>,
    %c0_23 = arith.constant 0 : index
    %c0_24 = arith.constant 0 : index
    %36 = vector.load %arg11[%c0_23, %c0_24] : memref<8x1xf32, #tpu.memory_space<vmem>>, vector<8x1xf32>
    tpu.vector_store %arg11[%c0_23, %c0_24], %14 {strides = array<i32>} : memref<8x1xf32, #tpu.memory_space<vmem>>, vector<8x1xf32>,
    %c1_i32 = arith.constant 1 : i32
    %37 = arith.cmpi eq, %arg2, %c1_i32 : i32
    %38 = arith.extui %37 : i1 to i32
    %c0_i32_25 = arith.constant 0 : i32
    %39 = arith.cmpi ne, %38, %c0_i32_25 : i32
    scf.if %39 {
      %c0_26 = arith.constant 0 : index
      %c0_27 = arith.constant 0 : index
      %40 = vector.load %arg13[%c0_26, %c0_27] : memref<8x128xf32, #tpu.memory_space<vmem>>, vector<8x128xf32>
      %c0_28 = arith.constant 0 : index
      %c0_29 = arith.constant 0 : index
      %41 = vector.load %arg12[%c0_28, %c0_29] : memref<8x1xf32, #tpu.memory_space<vmem>>, vector<8x1xf32>
      %42 = tpu.reciprocal %41 {approx = true} : vector<8x1xf32> -> vector<8x1xf32>
      %43 = vector.broadcast %42 : vector<8x1xf32> to vector<8x128xf32>
      %44 = arith.mulf %40, %43 : vector<8x128xf32>
      %c0_30 = arith.constant 0 : index
      %c0_31 = arith.constant 0 : index
      %c0_32 = arith.constant 0 : index
      %45 = vector.load %arg9[%c0_30, %c0_31, %c0_32] : memref<1x8x128xf32, #tpu.memory_space<vmem>>, vector<1x8x128xf32>
      %46 = vector.shape_cast %45 : vector<1x8x128xf32> to vector<8x128xf32>
      %47 = vector.shape_cast %44 : vector<8x128xf32> to vector<1x8x128xf32>
      tpu.vector_store %arg9[%c0_30, %c0_31, %c0_32], %47 {strides = array<i32>} : memref<1x8x128xf32, #tpu.memory_space<vmem>>, vector<1x8x128xf32>,
    } else {
    }
    return
  }
  func.func @transform_0(%arg0: i32, %arg1: i32, %arg2: i32) -> i32 {
    %c0_i32 = arith.constant 0 : i32
    %c0_i32_0 = arith.constant 0 : i32
    return %c0_i32 : i32
  }
  func.func @transform_1(%arg0: i32, %arg1: i32, %arg2: i32) -> (i32, i32, i32) {
    %c0_i32 = arith.constant 0 : i32
    %c0_i32_0 = arith.constant 0 : i32
    return %arg0, %arg1, %c0_i32 : i32, i32, i32
  }
  func.func @transform_2(%arg0: i32, %arg1: i32, %arg2: i32) -> (i32, i32, i32) {
    %c0_i32 = arith.constant 0 : i32
    %c0_i32_0 = arith.constant 0 : i32
    %c0_i32_1 = arith.constant 0 : i32
    return %arg0, %c0_i32, %c0_i32_0 : i32, i32, i32
  }
  func.func @transform_3(%arg0: i32, %arg1: i32, %arg2: i32) -> (i32, i32, i32) {
    %c0_i32 = arith.constant 0 : i32
    %c0_i32_0 = arith.constant 0 : i32
    %c0_i32_1 = arith.constant 0 : i32
    return %arg0, %c0_i32, %c0_i32_0 : i32, i32, i32
  }
  func.func @transform_4(%arg0: i32, %arg1: i32, %arg2: i32) -> (i32, i32, i32) {
    %c0_i32 = arith.constant 0 : i32
    %c0_i32_0 = arith.constant 0 : i32
    return %arg0, %c0_i32, %arg2 : i32, i32, i32
  }
  func.func @transform_5(%arg0: i32, %arg1: i32, %arg2: i32) -> (i32, i32, i32) {
    %c0_i32 = arith.constant 0 : i32
    %c0_i32_0 = arith.constant 0 : i32
    return %arg0, %arg2, %c0_i32 : i32, i32, i32
  }
  func.func @transform_6(%arg0: i32, %arg1: i32, %arg2: i32) -> (i32, i32, i32) {
    %c0_i32 = arith.constant 0 : i32
    %c0_i32_0 = arith.constant 0 : i32
    return %arg0, %arg1, %c0_i32 : i32, i32, i32
  }
}

</mosaic_0001>

<bundles_post_ra>
// kernel: tpu_custom_call.1
= control target key start
LH: loop header
LB: loop body
LE: loop exit
PB: predicated region body
PF: predicated region fallthrough
CT: control target
= control target key end

     0   :  { %s2310_s0 = inlined_call_operand.hbm [shape: f32[2], index: 0, kind: input, shape index: {}]   ;;  %s2311_s1 = inlined_call_operand.hbm [shape: bf16[2,24,128], index: 1, kind: input, shape index: {}]   ;;  %s2312_s2 = inlined_call_operand.hbm [shape: bf16[2,128,128], index: 2, kind: input, shape index: {}]   ;;  %s2313_s3 = inlined_call_operand.vmem [shape: f32[2,1,128], index: 3, kind: input, shape index: {}]   ;;  %s2314_s4 = inlined_call_operand.hbm [shape: bf16[2,128,256], index: 4, kind: input, shape index: {}]   ;;  %s2315_s5 = inlined_call_operand.hbm [shape: bf16[2,256,128], index: 5, kind: input, shape index: {}]   ;;  %s2316_s6 = inlined_call_operand.hbm [shape: f32[2,24,128], index: 6, kind: output, shape index: {}]  }
   0x1   :  { %2349 = sst [smem:[#allocation39_spill]] %s2310_s0 }
   0x2   :  { %2350 = sst [smem:[#allocation40_spill]] %s2311_s1 }
   0x3   :  { %2351 = sst [smem:[#allocation41_spill]] %s2312_s2 }
   0x4   :  { %2352 = sst [smem:[#allocation42_spill]] %s2313_s3 }
   0x5   :  { %2353 = sst [smem:[#allocation43_spill]] %s2314_s4 }
   0x6   :  { %2354 = sst [smem:[#allocation44_spill]] %s2316_s6 }
   0x7   :  { %11 = vsyncpa [#allocation9], 0 }
   0x8   :  { %12 = vsyncpa [#allocation7], 0 }
   0x9   :  { %14 = vsyncpa [#allocation7 + $0x1], 0 }
   0xa   :  { %15 = vsyncpa [#allocation12], 0 }
   0xb   :  { %17 = vsyncpa [#allocation12 + $0x1], 0 }
   0xc   :  { %18 = vsyncpa [#allocation15], 0 }
   0xd   :  { %20 = vsyncpa [#allocation15 + $0x1], 0 }
   0xe   :  { %21 = vsyncpa [#allocation8], 0 }
   0xf   :  { %23 = vsyncpa [#allocation8 + $0x1], 0  ;;  %s1744_s21 = smov 0   ;;  %s1746_s22 = smov 0  }
  0x10   :  { %s1748_s23 = smov 0   ;;  %s1750_s24 = smov 0  }
  0x11   :  { %s1752_s25 = smov 0   ;;  %s1754_s26 = smov 0  }
  0x12   :  { %s1756_s27 = smov 0   ;;  %s1758_s28 = smov 0  }
  0x13   :  { %s1760_s29 = smov 0   ;;  %s1762_s30 = smov 0  }
  0x14   :  { %s1764_s7 = smov 0   ;;  %s1766_s8 = smov 0  }
  0x15   :  { %s1768_s9 = smov 0   ;;  %s1770_s10 = smov 0  }
  0x16   :  { %s1772_s11 = smov 0   ;;  %s1774_s12 = smov 0  }
  0x17 LB: > { %2355 = sst [smem:[#allocation23_spill]] %s1635_s22  ;;  %p86_p0 = scmp.eq.s32.totalorder %s1691_s12, 0  ;;  %s1691_s12 = sphi %s1774_s12, %s29_s12   ;;  %s1687_s11 = sphi %s1772_s11, %s2440_s11   ;;  %s1683_s10 = sphi %s1770_s10, %s2439_s10   ;;  %s1679_s9 = sphi %s1768_s9, %s2438_s9   ;;  %s1675_s8 = sphi %s1766_s8, %s2437_s8   ;;  %s1671_s7 = sphi %s1764_s7, %s2436_s7   ;;  %s1667_s30 = sphi %s1762_s30, %s2435_s30   ;;  %s1663_s29 = sphi %s1760_s29, %s2434_s29   ;;  %s1659_s28 = sphi %s1758_s28, %s2433_s28   ;;  %s1655_s27 = sphi %s1756_s27, %s2432_s27   ;;  %s1651_s26 = sphi %s1754_s26, %s2431_s26   ;;  %s1647_s25 = sphi %s1752_s25, %s2430_s25   ;;  %s1643_s24 = sphi %s1750_s24, %s2421_s24   ;;  %s1639_s23 = sphi %s1748_s23, %s2429_s23   ;;  %s1635_s22 = sphi %s1746_s22, %s2428_s22   ;;  %s1631_s21 = sphi %s1744_s21, %s2420_s21  }
  0x18   : > { %2356 = sst [smem:[#allocation24_spill]] %s1647_s25  ;;  %p111_p1 = scmp.ne.s32.totalorder %s1651_s26, %s1647_s25 }
  0x19   : > { %2357 = sst [smem:[#allocation25_spill]] %s1655_s27  ;;  %p2319_p2 = scmp.lt.s32.totalorder %s1691_s12, 12 }
  0x1a   : > { %2358 = sst [smem:[#allocation26_spill]] %s1659_s28  ;;  %s280_s14 = sand.u32 1, %s1691_s12  }
  0x1b   : > { %2359 = sst [smem:[#allocation27_spill]] %s1667_s30  ;;  %p113_p3 = por %p111_p1, %p86_p0 }
  0x1c   : > { %2360 = sst [smem:[#allocation28_spill]] %s1671_s7  ;;  %s282_s15 = sand.u32 1, %s1651_s26  }
  0x1d   : > { %2361 = sst [smem:[#allocation29_spill]] %s1675_s8  ;;  %s1079_s16 = sshll.u32 %s1687_s11, 10 }
  0x1e   : > { %s1031_s17 = sshll.u32 %s282_s15, 6  ;;  %s2362_s2 = sld [smem:[#allocation41_spill]] }
  0x1f   : > { %p1841_p4 = pnand %p2319_p2, %p113_p3  ;;  %s284_s6 = scalar_lea.vmem [#allocation11], %s1031_s17 }
  0x20   : > { %s291_s7 = sshll.u32 %s284_s6, 4  ;;  %s1847_s15 = scalar_lea.sflag [#allocation12], %s280_s14  ;;  %s1845_s7 = int_to_ptr.vmem [resolvable:$true] %s291_s7 }
  0x21   : > { %p1382_p6 = pneg %p1841_p4 }
  0x24   : > { %s1837_s20 = scalar_lea.hbm %s2362_s2, %s1079_s16  ;;  %s1385_s30 = scalar_lea.hbm %s2362_s2, 2048 }
  0x25   : > { %s1380_s18 = scalar_lea.hbm %s1837_s20, 1024  ;;  %p1386_p9 = scmp.lt.u32.totalorder %s1837_s20, %s2362_s2 }
  0x26   : > { %p1381_p5 = scmp.ne.s32.totalorder %s1837_s20, %s1380_s18  ;;  %p1387_p10 = scmp.lt.u32.totalorder %s1385_s30, %s1380_s18 }
  0x27   : > { %p1389_p12 = scmp.lt.u32.totalorder %s1380_s18, %s1837_s20 }
  0x28   : > { %p1383_p7 = pnand %p1382_p6, %p1381_p5  ;;  %p1388_p11 = por %p1387_p10, %p1386_p9 }
  0x2a   : > { %p1384_p8 = pneg %p1383_p7  ;;  %p1390_p13 = por %p1389_p12, %p1388_p11 }
  0x2c   : > { %p1391_p1 = pnand %p1390_p13, %p1384_p8 }
  0x2e   : > { %1394 = shalt.err (!%p1391_p1)
}
  0x2f   : > { %s1395_s6 = scalar_lea.vmem %s1845_s7, 1024  ;;  %s1693_s14 = smov [#allocation11]  }
  0x30   : > { %p1396_p3 = scmp.ne.s32.totalorder %s1845_s7, %s1395_s6  ;;  %s1400_s17 = sshll.u32 %s1693_s14, 4  ;;  %s1401_s17 = int_to_ptr.vmem [resolvable:$false] %s1400_s17 }
  0x31   : > { %s1402_s3 = scalar_lea.vmem %s1401_s17, 2048  ;;  %p1403_p2 = scmp.lt.s32.totalorder %s1845_s7, %s1401_s17 }
  0x32   : > { %p1398_p5 = pnand %p1396_p3, %p1382_p6  ;;  %p1404_p9 = scmp.lt.s32.totalorder %s1402_s3, %s1395_s6 }
  0x34   : > { %p1399_p7 = pneg %p1398_p5  ;;  %p1405_p10 = por %p1404_p9, %p1403_p2 }
  0x36   : > { %p1406_p11 = pnand %p1405_p10, %p1399_p7 }
  0x38   : > { %1409 = shalt.err (!%p1406_p11)
}
  0x39   : > { %s2320_s30 = smov 64   ;;  %s2322_s8 = smov 4  }
  0x3a   : > { %1193 = dma.hbm_to_vmem [thread:$0]  (!%p1841_p4), %s1837_s20, 1024, %s1845_s7, %s1847_s15, %s2320_s30, %s2320_s30, %s2322_s8  }
  0x3b   : > { %s1879_s18 = sadd.s32 4294967295, %s1691_s12   ;;  %p117_p6 = scmp.ne.s32.totalorder %s1647_s25, %s1643_s24 }
  0x3c   : > { %2364 = sst [smem:[#allocation30_spill]] %s1879_s18  ;;  %p2325_p2 = scmp.eq.s32.totalorder %s1879_s18, 0 }
  0x3d   : > { %p165_p8 = scmp.ne.s32.totalorder %s1639_s23, %s1635_s22  ;;  %p171_p12 = scmp.ne.s32.totalorder %s1635_s22, %s1631_s21 }
  0x3e   : > { %p1890_p13 = por %p117_p6, %p2325_p2  ;;  %p1026_p5 = scmp.ge.s32.totalorder %s1691_s12, 1 }
  0x3f   : > { %p167_p3 = por %p165_p8, %p86_p0  ;;  %p1899_p4 = por %p171_p12, %p2325_p2 }
  0x40   : > { %s2365_s16 = scalar_select %p1890_p13, 1, 0 }
  0x41   : > { %s2367_s7 = scalar_select %p1899_p4, 1, 0 }
  0x42   : > { %2366 = sst [smem:[#allocation31_spill]] %s2365_s16  ;;  %p238_p7 = scmp.lt.s32.totalorder %s1691_s12, 13 }
  0x43   : > { %2368 = sst [smem:[#allocation32_spill]] %s2367_s7  ;;  %p2370_p10 = scmp.lt.s32.totalorder %s1691_s12, 12 }
  0x44   : > { %p1905_p9 = pnand %p1026_p5, %p238_p7  ;;  %s2372_s0 = sld [smem:[#allocation39_spill]] }
  0x45   : > { %p1911_p11 = pnand %p2370_p10, %p167_p3 }
  0x46   : > { %s2369_s13 = scalar_select %p1905_p9, 1, 0 }
  0x47   : > { %p1183_p6 = pneg %p1905_p9 }
  0x49   : > { %p1184_p8 = pnand %p1183_p6, %p2325_p2 }
  0x4a   : > { %s1410_s19 = scalar_lea.hbm %s2372_s0, 16 }
  0x4b   : > { %p1411_p12 = scmp.ne.s32.totalorder %s2372_s0, %s1410_s19  ;;  %p1412_p5 = pneg %p1184_p8 }
  0x4c   : > { %p1417_p3 = scmp.lt.u32.totalorder %s1410_s19, %s2372_s0 }
  0x4d   : > { %p1413_p7 = pnand %p1412_p5, %p1411_p12 }
  0x4f   : > { %p1414_p1 = pneg %p1413_p7 }
  0x51   : > { %p1419_p10 = pnand %p1417_p3, %p1414_p1 }
  0x53   : > { %1422 = shalt.err (!%p1419_p10)
}
  0x54   : > { %s1696_s30 = smov [#allocation6]   ;;  %s1025_s24 = sadd.s32 4294967294, %s1691_s12  }
  0x55   : > { %1186 = dma.hbm_to_smem (!%p1184_p8), %s2372_s0, 16, %s1696_s30, [#allocation9]  }
  0x56   : > { %s41_s2 = sadd.s32 1, %s1679_s9  ;;  %s44_s8 = sadd.s32 1, %s1683_s10 }
  0x57   : > { %p42_p1 = scmp.ge.s32.totalorder %s41_s2, 2  ;;  %s48_s20 = sadd.s32 1, %s1687_s11 }
  0x58   : > { %s78_s19 = sadd.s32 1, %s1663_s29  ;;  %p85_p6 = scmp.ne.s32.totalorder %s1663_s29, %s1659_s28 }
  0x59   : > { %s2442_s2 = smov (%p42_p1, %s41_s2), 0  ;;  %s2444_s8 = smov (!%p42_p1, %s44_s8), %s1683_s10 }
  0x5a   : > { %2373 = sst [smem:[#allocation33_spill]] %s2442_s2  ;;  %p91_p8 = scmp.ne.s32.totalorder %s1659_s28, %s1655_s27 }
  0x5b   : > { %p46_p12 = scmp.ge.s32.totalorder %s2444_s8, 3  ;;  %s154_s30 = ssub.s32 %s1679_s9, %s2442_s2 }
  0x5c   : > { %p1947_p5 = por %p86_p0, %p85_p6  ;;  %p1956_p7 = por %p2325_p2, %p91_p8 }
  0x5d   : > { %s2446_s8 = smov (%p46_p12, %s2444_s8), 0  ;;  %s2448_s20 = smov (!%p46_p12, %s48_s20), %s1687_s11 }
  0x5e   : > { %s2375_s14 = scalar_select %p1956_p7, 1, 0 }
  0x5f   : > { %2377 = sst [smem:[#allocation35_spill]] %s2446_s8  ;;  %s74_s17 = ssub.s32 %s1683_s10, %s2446_s8 }
  0x60   : > { %2376 = sst [smem:[#allocation34_spill]] %s2375_s14  ;;  %s158_s3 = sadd.s32 1, %s1639_s23 }
  0x61   : > { %p50_p0 = scmp.ge.s32.totalorder %s2448_s20, 2  ;;  %p2378_p3 = scmp.eq.s32.totalorder %s1879_s18, 11 }
  0x62   : > { %p231_p1 = scmp.eq.s32.totalorder %s1025_s24, 11  ;;  %s260_s2 = sand.u32 1, %s1663_s29  }
  0x63   : > { %p1968_p10 = por %p2378_p3, %p85_p6  ;;  %s2450_s20 = smov (%p50_p0, %s2448_s20), 0 }
  0x64   : > { %2381 = sst [smem:[#allocation37_spill]] %s2450_s20  ;;  %p1978_p2 = por %p231_p1, %p91_p8 }
  0x65   : > { %s2379_s0 = scalar_select %p1968_p10, 1, 0 }
  0x66   : > { %s2382_s7 = scalar_select %p1978_p2, 1, 0 }
  0x67   : > { %2380 = sst [smem:[#allocation36_spill]] %s2379_s0  ;;  %s73_s8 = ssub.s32 %s1687_s11, %s2450_s20 }
  0x68   : > { %2383 = sst [smem:[#allocation38_spill]] %s2382_s7  ;;  %s1029_s22 = sshll.u32 %s260_s2, 2 }
  0x69   : > { %s75_s16 = sor.u32 %s74_s17, %s73_s8  ;;  %p102_p6 = scmp.eq.s32.totalorder %s73_s8, 0 }
  0x6a   : > { %p76_p12 = scmp.eq.s32.totalorder %s75_s16, 0  ;;  %s155_s24 = sor.u32 %s154_s30, %s73_s8 }
  0x6b   : > { %s2384_s0 = sadd.s32 1, %s1651_s26  ;;  %p156_p0 = scmp.eq.s32.totalorder %s155_s24, 0 }
  0x6c   : > { %s1987_s25 = scalar_select %p102_p6, %s1651_s26, %s2384_s0  }
  0x6d   : > { %s1990_s14 = scalar_select %p76_p12, %s1663_s29, %s78_s19  }
  0x6e   : > { %s1167_s27 = smul.u32 3, %s1687_s11  ;;  %s264_s28 = scalar_lea.vmem [#allocation10], %s1029_s22 }
  0x6f   : > { %s273_s18 = sshll.u32 %s264_s28, 4  ;;  %p2385_p8 = scmp.lt.s32.totalorder %s1691_s12, 12  ;;  %s1997_s18 = int_to_ptr.vmem [resolvable:$true] %s273_s18 }
  0x70   : > { %s1994_s7 = scalar_select %p156_p0, %s1639_s23, %s158_s3  }
  0x71   : > { %s269_s20 = sadd.s32 %s1683_s10, %s1167_s27  ;;  %p2003_p3 = pnand %p2385_p8, %p1947_p5 }
  0x72   : > { %s1030_s17 = sshll.u32 %s269_s20, 6  ;;  %s2387_s1 = sld [smem:[#allocation40_spill]] }
  0x73   : > { %s2348_s22 = sand.u32 1, %s1639_s23   ;;  %s261_s28 = scalar_lea.sflag [#allocation7], %s260_s2 }
  0x74   : > { %s2015_s27 = sshll.u32 %s2348_s22, 6  ;;  %p1425_p1 = pneg %p2003_p3 }
  0x78   : > { %s2010_s19 = scalar_lea.hbm %s2387_s1, %s1030_s17  ;;  %s1428_s3 = scalar_lea.hbm %s2387_s1, 384 }
  0x79   : > { %s1423_s20 = scalar_lea.hbm %s2010_s19, 64  ;;  %p1429_p0 = scmp.lt.u32.totalorder %s2010_s19, %s2387_s1 }
  0x7a   : > { %p1424_p5 = scmp.ne.s32.totalorder %s2010_s19, %s1423_s20  ;;  %p1430_p8 = scmp.lt.u32.totalorder %s1428_s3, %s1423_s20 }
  0x7b   : > { %p1432_p10 = scmp.lt.u32.totalorder %s1423_s20, %s2010_s19 }
  0x7c   : > { %p1426_p6 = pnand %p1425_p1, %p1424_p5  ;;  %p1431_p2 = por %p1430_p8, %p1429_p0 }
  0x7e   : > { %p1427_p12 = pneg %p1426_p6  ;;  %p1433_p4 = por %p1432_p10, %p1431_p2 }
  0x80   : > { %p1434_p13 = pnand %p1433_p4, %p1427_p12 }
  0x82   : > { %1437 = shalt.err (!%p1434_p13)
}
  0x83   : > { %s1438_s2 = scalar_lea.vmem %s1997_s18, 64  ;;  %s1697_s0 = smov [#allocation10]  }
  0x84   : > { %p1439_p5 = scmp.ne.s32.totalorder %s1997_s18, %s1438_s2  ;;  %s1443_s8 = sshll.u32 %s1697_s0, 4  ;;  %s1444_s8 = int_to_ptr.vmem [resolvable:$false] %s1443_s8 }
  0x85   : > { %s1445_s30 = scalar_lea.vmem %s1444_s8, 128  ;;  %p1446_p9 = scmp.lt.s32.totalorder %s1997_s18, %s1444_s8 }
  0x86   : > { %p1441_p6 = pnand %p1439_p5, %p1425_p1  ;;  %p1447_p0 = scmp.lt.s32.totalorder %s1445_s30, %s1438_s2 }
  0x88   : > { %p1442_p7 = pneg %p1441_p6  ;;  %p1448_p8 = por %p1447_p0, %p1446_p9 }
  0x8a   : > { %p1449_p2 = pnand %p1448_p8, %p1442_p7 }
  0x8c   : > { %1452 = shalt.err (!%p1449_p2)
}
  0x8d   : > { %1190 = dma.hbm_to_vmem [thread:$0]  (!%p2003_p3), %s2010_s19, 64, %s1997_s18, %s261_s28  }
  0x8e   : > { %s1035_s20 = sshll.u32 %s1687_s11, 5  ;;  %s311_s3 = scalar_lea.vmem [#allocation13], %s2015_s27 }
  0x8f   : > { %s316_s6 = sadd.s32 %s1679_s9, %s1035_s20  ;;  %s319_s24 = sshll.u32 %s311_s3, 4  ;;  %s2047_s24 = int_to_ptr.vmem [resolvable:$true] %s319_s24 }
  0x90   : > { %s1036_s17 = sshll.u32 %s316_s6, 6  ;;  %s2388_s4 = sld [smem:[#allocation43_spill]] }
  0x91   : > { %p1455_p4 = pneg %p1911_p11 }
  0x96   : > { %s2052_s16 = scalar_lea.hbm %s2388_s4, %s1036_s17  ;;  %s1458_s28 = scalar_lea.hbm %s2388_s4, 4096 }
  0x97   : > { %s1453_s8 = scalar_lea.hbm %s2052_s16, 1024  ;;  %p1459_p10 = scmp.lt.u32.totalorder %s2052_s16, %s2388_s4 }
  0x98   : > { %p1454_p13 = scmp.ne.s32.totalorder %s2052_s16, %s1453_s8  ;;  %p1460_p3 = scmp.lt.u32.totalorder %s1458_s28, %s1453_s8 }
  0x99   : > { %p1462_p12 = scmp.lt.u32.totalorder %s1453_s8, %s2052_s16 }
  0x9a   : > { %p1456_p9 = pnand %p1455_p4, %p1454_p13  ;;  %p1461_p1 = por %p1460_p3, %p1459_p10 }
  0x9c   : > { %p1457_p7 = pneg %p1456_p9  ;;  %p1463_p5 = por %p1462_p12, %p1461_p1 }
  0x9e   : > { %p1464_p6 = pnand %p1463_p5, %p1457_p7 }
  0xa0   : > { %1467 = shalt.err (!%p1464_p6)
}
  0xa1   : > { %s1468_s3 = scalar_lea.vmem %s2047_s24, 1024  ;;  %s1698_s17 = smov [#allocation13]  }
  0xa2   : > { %p1469_p0 = scmp.ne.s32.totalorder %s2047_s24, %s1468_s3  ;;  %s1473_s2 = sshll.u32 %s1698_s17, 4  ;;  %s1474_s2 = int_to_ptr.vmem [resolvable:$false] %s1473_s2 }
  0xa3   : > { %s1475_s0 = scalar_lea.vmem %s1474_s2, 2048  ;;  %p1476_p13 = scmp.lt.s32.totalorder %s2047_s24, %s1474_s2 }
  0xa4   : > { %p1471_p8 = pnand %p1469_p0, %p1455_p4  ;;  %p1477_p9 = scmp.lt.s32.totalorder %s1475_s0, %s1468_s3 }
  0xa6   : > { %p1472_p2 = pneg %p1471_p8  ;;  %p1478_p10 = por %p1477_p9, %p1476_p13 }
  0xa8   : > { %p1479_p3 = pnand %p1478_p10, %p1472_p2 }
  0xaa   : > { %1482 = shalt.err (!%p1479_p3)
}
  0xab   : > { %s1699_s8 = smov 128   ;;  %s2389_s18 = smov 4  }
  0xac   : > { %s2390_s19 = smov 64   ;;  %s1038_s28 = sshll.u32 %s1679_s9, 4 }
  0xad   : > { %1196 = dma.hbm_to_vmem [thread:$0]  (!%p1911_p11), %s2052_s16, 1024, %s2047_s24, %s1847_s15, %s1699_s8, %s2390_s19, %s2389_s18  }
  0xae   : > { %s333_s30 = scalar_lea.vmem [#allocation14], %s2015_s27  ;;  %s339_s3 = sadd.s32 %s1038_s28, %s1035_s20 }
  0xaf   : > { %s342_s6 = sshll.u32 %s333_s30, 4  ;;  %s1040_s17 = sshll.u32 %s339_s3, 6  ;;  %s2086_s6 = int_to_ptr.vmem [resolvable:$true] %s342_s6 }
  0xb0   : > { %s2091_s22 = scalar_lea.hbm %s2315_s5, %s1040_s17  ;;  %s2391_s1 = sand.u32 1, %s1639_s23  }
  0xb1   : > { %s2095_s4 = scalar_lea.sflag [#allocation15], %s2391_s1  ;;  %s1483_s15 = scalar_lea.hbm %s2091_s22, 1024 }
  0xb2   : > { %p1484_p7 = scmp.ne.s32.totalorder %s2091_s22, %s1483_s15  ;;  %s1488_s24 = scalar_lea.hbm %s2315_s5, 4096 }
  0xb3   : > { %p1489_p5 = scmp.lt.u32.totalorder %s2091_s22, %s2315_s5  ;;  %p1490_p6 = scmp.lt.u32.totalorder %s1488_s24, %s1483_s15 }
  0xb4   : > { %p1486_p1 = pnand %p1484_p7, %p1455_p4  ;;  %p1492_p8 = scmp.lt.u32.totalorder %s1483_s15, %s2091_s22 }
  0xb5   : > { %p1491_p0 = por %p1490_p6, %p1489_p5 }
  0xb6   : > { %p1487_p12 = pneg %p1486_p1 }
  0xb7   : > { %p1493_p2 = por %p1492_p8, %p1491_p0 }
  0xb9   : > { %p1494_p13 = pnand %p1493_p2, %p1487_p12 }
  0xbb   : > { %1497 = shalt.err (!%p1494_p13)
}
  0xbc   : > { %s1498_s1 = scalar_lea.vmem %s2086_s6, 1024  ;;  %s1700_s28 = smov [#allocation14]  }
  0xbd   : > { %p1499_p9 = scmp.ne.s32.totalorder %s2086_s6, %s1498_s1  ;;  %s1503_s30 = sshll.u32 %s1700_s28, 4  ;;  %s1504_s30 = int_to_ptr.vmem [resolvable:$false] %s1503_s30 }
  0xbe   : > { %s1505_s3 = scalar_lea.vmem %s1504_s30, 2048  ;;  %p1506_p7 = scmp.lt.s32.totalorder %s2086_s6, %s1504_s30 }
  0xbf   : > { %p1501_p10 = pnand %p1499_p9, %p1455_p4  ;;  %p1507_p1 = scmp.lt.s32.totalorder %s1505_s3, %s1498_s1 }
  0xc1   : > { %p1502_p3 = pneg %p1501_p10  ;;  %p1508_p5 = por %p1507_p1, %p1506_p7 }
  0xc3   : > { %p1509_p6 = pnand %p1508_p5, %p1502_p3 }
  0xc5   : > { %1512 = shalt.err (!%p1509_p6)
}
  0xc6   : > { %1199 = dma.hbm_to_vmem [thread:$0]  (!%p1911_p11), %s2091_s22, 1024, %s2086_s6, %s2095_s4, %s2390_s19, %s2390_s19, %s2389_s18  }
  0xc7   : > { %p2392_p4 = scmp.ne.s32.totalorder %s2369_s13, 0 }
  0xc8   : > { %s2393_s17 = sld [smem:[#allocation30_spill]] (!%p2392_p4) }
  0xc9   : > { %354 = sbr.rel (%p2392_p4) target bundleno = 1358 (0x54e), region = 44 }
  0xce   : > { %p2394_p12 = scmp.eq.s32.totalorder (!%p2392_p4), %s2393_s17, 0 }
  0xd0   : > { %1606 = dma.done.wait (%p2394_p12), [#allocation9], 16   ;;  %p2395_p0 = pmov %p2394_p12 }
  0xd1   : > { %s2396_s2 = sld [smem:[#allocation26_spill]]  ;;  %s2397_s0 = sld [smem:[#allocation34_spill]] }
  0xd2   : > { %1608 = vsyncadd (%p2395_p0), [#allocation9], 4294967280 }
  0xd7   : > { %s2131_s15 = sand.u32 1, %s2396_s2   ;;  %p2398_p11 = scmp.ne.s32.totalorder %s2397_s0, 0 }
  0xd8   : > { %s1043_s21 = sshll.u32 %s2131_s15, 2  ;;  %s361_s27 = scalar_lea.sflag [#allocation7], %s2131_s15 }
  0xd9   : > { %s2135_s20 = scalar_lea.vmem [#allocation10], %s1043_s21 }
  0xda   : > { %1610 = dma.done.wait (%p2398_p11), %s361_s27, 64  }
  0xdb   : > { %1612 = vsyncadd (%p2398_p11), %s361_s27, 4294967232  ;;  %s2399_s4 = sld [smem:[#allocation24_spill]]  ;;  %s2400_s13 = sld [smem:[#allocation31_spill]] }
  0xdc   : > { %s369_s22 = sand.u32 1, %s2393_s17  }
  0xdd   : > { %s370_s6 = scalar_lea.sflag [#allocation12], %s369_s22 }
  0xe1   : > { %s371_s18 = sand.u32 1, %s2399_s4   ;;  %p2401_p8 = scmp.ne.s32.totalorder %s2400_s13, 0 }
  0xe2   : > { %s1044_s19 = sshll.u32 %s371_s18, 6 }
  0xe3   : > { %s2143_s24 = scalar_lea.vmem [#allocation11], %s1044_s19 }
  0xe4   : > { %1614 = dma.done.wait (%p2401_p8), %s370_s6, 1024  }
  0xe5   : > { %1616 = vsyncadd (%p2401_p8), %s370_s6, 4294966272  ;;  %s2402_s16 = sld [smem:[#allocation23_spill]]  ;;  %s2403_s8 = sld [smem:[#allocation32_spill]] }
  0xeb   : > { %s380_s1 = sand.u32 1, %s2402_s16   ;;  %p2404_p2 = scmp.ne.s32.totalorder %s2403_s8, 0 }
  0xec   : > { %s1045_s28 = sshll.u32 %s380_s1, 6 }
  0xed   : > { %s2150_s30 = scalar_lea.vmem [#allocation13], %s1045_s28 }
  0xee   : > { %1618 = dma.done.wait (%p2404_p2), %s370_s6, 1024  }
  0xef   : > { %1620 = vsyncadd (%p2404_p2), %s370_s6, 4294966272  ;;  %s388_s3 = scalar_lea.sflag [#allocation15], %s380_s1  ;;  %s2156_s17 = scalar_lea.vmem [#allocation14], %s1045_s28 }
  0xf0   : > { %1622 = dma.done.wait (%p2404_p2), %s388_s3, 1024  }
  0xf1   : > { %1624 = vsyncadd (%p2404_p2), %s388_s3, 4294966272 }
  0xf2   : > { %396 = sfence }
  0xf3   : > { %s2405_s2 = sld [smem:[#allocation29_spill]]  ;;  %s1047_s0 = sshll.u32 %s2131_s15, 3 }
  0xf4   : > { %s2406_s4 = sld [smem:[#allocation42_spill]]  ;;  %s2171_s22 = scalar_lea.vmem [#allocation16], %s1047_s0 }
  0xf5   : > { %s2407_s18 = sld [smem:[#allocation27_spill]] }
  0xf9   : > { %p439_p13 = scmp.lt.s32.totalorder %s2405_s2, 1 }
  0xfb   : > { %s2452_s2 = smov (!%p439_p13, %s2405_s2), 1  ;;  %p1048_p9 = scmp.ne.s32.totalorder %s2407_s18, 0 }
  0xfc   : > { %s441_s13 = scalar_lea.vmem %s2406_s4, %s2452_s2  ;;  %vm562_vm0 = vcmask (!%p1048_p9), 7168   ;;  %v1347_v0 = vld [vmem:[%s2143_s24] sm:$0xff] (!%p1048_p9)   ;;  %v1701_v1 = vmov (!%p1048_p9), 0.0   ;;  %v1702_v2 = vmov (!%p1048_p9), -inf   ;;  %v1348_v3 = vld [vmem:[%s2143_s24 + $0x8] sm:$0xff] (!%p1048_p9)   ;;  %vm1703_vm1 = vmmov (!%p1048_p9), 0  }
  0xfd   : > { %447 = sbr.rel (%p1048_p9) target bundleno = 502 (0x1f6), region = 68  ;;  %1107 = vmatprep.subr.bf16.mxu0 (!%p1048_p9), %v1701_v1  ;;  %563 = vst.msk [vmem:[#allocation3] sm:$0xff] (!%p1048_p9), %vm562_vm0, %v1702_v2  ;;  %564 = vst.msk [vmem:[#allocation4] sm:$0xff] (!%p1048_p9), %vm562_vm0, %v1701_v1  ;;  %1123 = vmatprep.mubr.msk.bf16.mxu0 (!%p1048_p9), %vm1703_vm1, %v1701_v1  ;;  %v1349_v4 = vld [vmem:[%s2143_s24 + $0x10] sm:$0xff] (!%p1048_p9)   ;;  %v1350_v5 = vld [vmem:[%s2143_s24 + $0x18] sm:$0xff] (!%p1048_p9)  }
  0xfe   : > { %565 = vst [vmem:[#allocation5] sm:$0xff] (!%p1048_p9), %v1701_v1  ;;  %1108 = vmatpush3.bf16.msra.mxu0 (!%p1048_p9), %v1347_v0  ;;  %v1351_v6 = vld [vmem:[%s2143_s24 + $0x20] sm:$0xff] (!%p1048_p9)   ;;  %v1352_v7 = vld [vmem:[%s2143_s24 + $0x28] sm:$0xff] (!%p1048_p9)   ;;  %v1353_v8 = vld [vmem:[%s2143_s24 + $0x30] sm:$0xff] (!%p1048_p9)  }
  0xff   : > { %1109 = vmatprep.subr.bf16.mxu0 (!%p1048_p9), %v1701_v1  ;;  %v1354_v9 = vld [vmem:[%s2143_s24 + $0x38] sm:$0xff] (!%p1048_p9)   ;;  %v1049_v11 = vld [vmem:[%s441_s13] ss:$0 sm:$0xff] (!%p1048_p9) }
 0x100   : > { %v448_v10 = vld [vmem:[%s2135_s20] sm:$0xf] (!%p1048_p9) }
 0x102   : > { %1110 = vmatpush3.bf16.msra.mxu0 (!%p1048_p9), %v1348_v3 }
 0x103   : > { %1111 = vmatprep.subr.bf16.mxu0 (!%p1048_p9), %v1701_v1 }
 0x106   : > { %1112 = vmatpush3.bf16.msra.mxu0 %v1349_v4 }
 0x107   : > { %1113 = vmatprep.subr.bf16.mxu0 %v1701_v1 }
 0x10a   : > { %1114 = vmatpush3.bf16.msra.mxu0 %v1350_v5 }
 0x10b   : > { %1115 = vmatprep.subr.bf16.mxu0 %v1701_v1 }
 0x10e   : > { %1116 = vmatpush3.bf16.msra.mxu0 %v1351_v6 }
 0x10f   : > { %1117 = vmatprep.subr.bf16.mxu0 %v1701_v1 }
 0x112   : > { %1118 = vmatpush3.bf16.msra.mxu0 %v1352_v7 }
 0x113   : > { %1119 = vmatprep.subr.bf16.mxu0 %v1701_v1 }
 0x116   : > { %1120 = vmatpush3.bf16.msra.mxu0 %v1353_v8 }
 0x117   : > { %1121 = vmatprep.subr.bf16.mxu0 %v1701_v1 }
 0x11a   : > { %1122 = vmatpush3.bf16.msra.mxu0 %v1354_v9 }
 0x11d   : > { %1124 = vmatmul.mubr.bf16.vlgmr.msra.gmra.mrb[0].mxu0 %v448_v10 }
 0x1f0   : > { %v554_v12 = vpop.f32.mrb[0].mxu0 }
 0x1f1   : > { %v555_v13 = vadd.f32 %v1049_v11, %v554_v12  ;;  %v1125_v14 = vpop.f32.mrb[1].mxu0 }
 0x1f2   : > { %v557_v15 = vpop.f32.mrb[2].mxu0 }
 0x1f3   : > { %v560_v16 = vpack.c.bf16 %v555_v13, %v555_v13  ;;  %v1126_v17 = vpop.f32.mrb[3].mxu0 }
 0x1f5   : > { %561 = vst [vmem:[#allocation2] sm:$0xf] %v560_v16 }
 0x1f6 PF: > { %v1357_v18 = vld [vmem:[%s2150_s30] sm:$0xff]   ;;  %v1704_v19 = vmov 0.0   ;;  %v1358_v20 = vld [vmem:[%s2150_s30 + $0x8] sm:$0xff]   ;;  %vm1705_vm2 = vmmov 0   ;;  %v1359_v21 = vld [vmem:[%s2150_s30 + $0x10] sm:$0xff]   ;;  %s2409_s20 = sld [smem:[#allocation29_spill]] }
 0x1f7   : > { %1127 = vmatprep.subr.bf16.mxu0 %v1704_v19  ;;  %1147 = vmatprep.subr.bf16.mxu1 %v1704_v19  ;;  %v1360_v22 = vld [vmem:[%s2150_s30 + $0x18] sm:$0xff]   ;;  %v1361_v23 = vld [vmem:[%s2150_s30 + $0x20] sm:$0xff]   ;;  %v1362_v24 = vld [vmem:[%s2150_s30 + $0x28] sm:$0xff]   ;;  %v1706_v34 = vmov 0   ;;  %vm694_vm3 = vcmask 7168   ;;  %s2410_s8 = sld [smem:[#allocation27_spill]] }
 0x1f8   : > { %1128 = vmatpush3.bf16.msra.mxu0 %v1357_v18  ;;  %1143 = vmatprep.mubr.msk.bf16.mxu0 %vm1705_vm2, %v1704_v19  ;;  %v1363_v25 = vld [vmem:[%s2150_s30 + $0x30] sm:$0xff]   ;;  %v1364_v26 = vld [vmem:[%s2150_s30 + $0x38] sm:$0xff]   ;;  %v1365_v35 = vld [vmem:[%s2156_s17] sm:$0xff]  }
 0x1f9   : > { %1129 = vmatprep.subr.bf16.mxu0 %v1704_v19  ;;  %1163 = vmatprep.mubr.msk.bf16.mxu1 %vm1705_vm2, %v1704_v19  ;;  %v1366_v36 = vld [vmem:[%s2156_s17 + $0x8] sm:$0xff]   ;;  %v1367_v37 = vld [vmem:[%s2156_s17 + $0x10] sm:$0xff]   ;;  %v1368_v38 = vld [vmem:[%s2156_s17 + $0x18] sm:$0xff]  }
 0x1fa   : > { %1355 = vset.pattern.permute.xlu0 %v1706_v34  ;;  %1356 = vset.pattern.permute.xlu1 %v1706_v34  ;;  %v674_v39 = vld [vmem:[#allocation3] sm:$0xff]  ;;  %v1370_v44 = vld [vmem:[%s2156_s17 + $0x28] sm:$0xff]   ;;  %v1371_v45 = vld [vmem:[%s2156_s17 + $0x30] sm:$0xff]  }
 0x1fb   : > { %1148 = vmatpush3.bf16.msra.mxu1 %v1365_v35  ;;  %v1369_v43 = vld [vmem:[%s2156_s17 + $0x20] sm:$0xff]   ;;  %v1372_v46 = vld [vmem:[%s2156_s17 + $0x38] sm:$0xff]   ;;  %v689_v54 = vld [vmem:[#allocation4] sm:$0xff] }
 0x1fc   : > { %1130 = vmatpush3.bf16.msra.mxu0 %v1358_v20  ;;  %v567_v27 = vld [vmem:[#allocation2] sm:$0xf]  ;;  %s566_s24 = sld [smem:[#allocation6 + %s2409_s20]]  ;;  %1149 = vmatprep.subr.bf16.mxu1 %v1704_v19  ;;  %v696_v58 = vld [vmem:[#allocation5] sm:$0xff] }
 0x1fd   : > { %1131 = vmatprep.subr.bf16.mxu0 %v1704_v19  ;;  %p1074_p10 = scmp.ne.s32.totalorder %s2410_s8, 1 }
 0x1fe   : > { %v1707_v3 = vmov (!%p1074_p10), 0  }
 0x1ff   : > { %1150 = vmatpush3.bf16.msra.mxu1 %v1366_v36 }
 0x200   : > { %1132 = vmatpush3.bf16.msra.mxu0 %v1359_v21  ;;  %1151 = vmatprep.subr.bf16.mxu1 %v1704_v19 }
 0x201   : > { %1133 = vmatprep.subr.bf16.mxu0 %v1704_v19 }
 0x202   : > { %v672_v28 = vstv %s566_s24 }
 0x203   : > { %1152 = vmatpush3.bf16.msra.mxu1 %v1367_v37 }
 0x204   : > { %1134 = vmatpush3.bf16.msra.mxu0 %v1360_v22  ;;  %1153 = vmatprep.subr.bf16.mxu1 %v1704_v19 }
 0x205   : > { %1135 = vmatprep.subr.bf16.mxu0 %v1704_v19 }
 0x207   : > { %1154 = vmatpush3.bf16.msra.mxu1 %v1368_v38 }
 0x208   : > { %1136 = vmatpush3.bf16.msra.mxu0 %v1361_v23  ;;  %1155 = vmatprep.subr.bf16.mxu1 %v1704_v19 }
 0x209   : > { %1137 = vmatprep.subr.bf16.mxu0 %v1704_v19 }
 0x20b   : > { %1156 = vmatpush3.bf16.msra.mxu1 %v1369_v43 }
 0x20c   : > { %1138 = vmatpush3.bf16.msra.mxu0 %v1362_v24  ;;  %1157 = vmatprep.subr.bf16.mxu1 %v1704_v19 }
 0x20d   : > { %1139 = vmatprep.subr.bf16.mxu0 %v1704_v19 }
 0x20f   : > { %1158 = vmatpush3.bf16.msra.mxu1 %v1370_v44 }
 0x210   : > { %1140 = vmatpush3.bf16.msra.mxu0 %v1363_v25  ;;  %1159 = vmatprep.subr.bf16.mxu1 %v1704_v19 }
 0x211   : > { %1141 = vmatprep.subr.bf16.mxu0 %v1704_v19 }
 0x213   : > { %1160 = vmatpush3.bf16.msra.mxu1 %v1371_v45 }
 0x214   : > { %1142 = vmatpush3.bf16.msra.mxu0 %v1364_v26  ;;  %1161 = vmatprep.subr.bf16.mxu1 %v1704_v19 }
 0x217   : > { %1144 = vmatmul.mubr.bf16.vlgmr.msra.gmra.mrb[0].mxu0 %v567_v27  ;;  %1162 = vmatpush3.bf16.msra.mxu1 %v1372_v46 }
 0x2ea   : > { %v666_v29 = vpop.f32.mrb[0].mxu0 }
 0x2eb   : > { %v673_v30 = vmul.f32 %v672_v28, %v666_v29  ;;  %v1145_v31 = vpop.f32.mrb[1].mxu0 }
 0x2ec   : > { %v669_v32 = vpop.f32.mrb[2].mxu0 }
 0x2ed   : > { %v1146_v33 = vpop.f32.mrb[3].mxu0  ;;  %675 = vmax.xlane.f32.xlu0 %v673_v30 }
 0x37a   : > { %v676_v40 = vpop.xlane.xlu0 %675 }
 0x37b   : > { %v677_v41 = vmax.f32 %v674_v39, %v676_v40 }
 0x37d   : > { %v678_v42 = vsub.f32 %v674_v39, %v677_v41  ;;  %810 = vst.msk [vmem:[#allocation3] sm:$0xff] %vm694_vm3, %v677_v41  ;;  %683 = vperm.xlu0 %1355, %v677_v41  }
 0x37f   : > { %v679_v52 = vmul.f32 1.442695, %v678_v42 }
 0x381   : > { %1377 = vset.pattern.permute.xlu0 (!%p1074_p10), %v1707_v3 }
 0x3fc   : > { %v684_v47 = vpop.permute.xlu0 %683 }
 0x3fd   : > { %v686_v48 = vsub.f32 %v673_v30, %v684_v47 }
 0x3ff   : > { %v687_v49 = vmul.f32 1.442695, %v686_v48 }
 0x401   : > { %1373 = vpow2.f32 %v687_v49 }
 0x402   : > { %1375 = vpow2.f32 %v679_v52 }
 0x40b   : > { %v1374_v50 = vpop.eup %1373 }
 0x40c   : > { %691 = vadd.xlane.f32.xlu1 %v1374_v50  ;;  %v703_v51 = vpack.c.bf16 %v1374_v50, %v1374_v50  ;;  %v1376_v53 = vpop.eup %1375 }
 0x40d   : > { %v690_v55 = vmul.f32 %v1376_v53, %v689_v54 }
 0x40e   : > { %1164 = vmatmul.mubr.bf16.vlgmr.msra.gmra.mrb[0].mxu1 %v703_v51 }
 0x41d   : > { %699 = vperm.xlu1 %1356, %v1376_v53  }
 0x499   : > { %v692_v56 = vpop.xlane.xlu1 %691 }
 0x49a   : > { %v693_v57 = vadd.f32 %v692_v56, %v690_v55 }
 0x49c   : > { %695 = vst.msk [vmem:[#allocation4] sm:$0xff] %vm694_vm3, %v693_v57 }
 0x49d   : > { %v700_v59 = vpop.permute.xlu1 %699 }
 0x49e   : > { %v702_v60 = vmul.f32 %v700_v59, %v696_v58 }
 0x4a3   : > { %v816_v2 = vld [vmem:[#allocation4] sm:$0xff] (!%p1074_p10) }
 0x4a4   : > { %1378 = vrcp.f32 (!%p1074_p10), %v816_v2 }
 0x4ae   : > { %v1379_v4 = vpop.eup (!%p1074_p10), %1378 }
 0x4af   : > { %820 = vperm.xlu0 (!%p1074_p10), %1377, %v1379_v4  }
 0x4de   : > { %814 = sbr.rel (%p1074_p10) target bundleno = 1330 (0x532), region = 72 }
 0x4e1   : > { %v802_v61 = vpop.f32.mrb[0].mxu1 }
 0x4e2   : > { %v808_v62 = vadd.f32 %v802_v61, %v702_v60  ;;  %v1165_v63 = vpop.f32.mrb[1].mxu1 }
 0x4e3   : > { %v805_v0 = vpop.f32.mrb[2].mxu1 }
 0x4e4   : > { %809 = vst [vmem:[#allocation5] sm:$0xff] %v808_v62  ;;  %v1166_v1 = vpop.f32.mrb[3].mxu1 }
 0x4eb   : > { %v815_v5 = vld [vmem:[#allocation5] sm:$0xff] }
 0x52e   : > { %v821_v6 = vpop.permute.xlu0 %820 }
 0x52f   : > { %v823_v7 = vmul.f32 %v821_v6, %v815_v5 }
 0x531   : > { %824 = vst [vmem:[%s2171_s22] sm:$0xff] %v823_v7 }
 0x532 PF: > { %s2411_s1 = sld [smem:[#allocation29_spill]]  ;;  %s2412_s28 = sld [smem:[#allocation28_spill]] }
 0x533   : > { %s2413_s30 = sld [smem:[#allocation36_spill]]  ;;  %s841_s17 = sshll.u32 %s2171_s22, 4  ;;  %s2230_s17 = int_to_ptr.vmem [resolvable:$true] %s841_s17 }
 0x534   : > { %s2414_s4 = sld [smem:[#allocation44_spill]]  ;;  %s826_s18 = scalar_lea.sflag [#allocation8], %s2131_s15 }
 0x535   : > { %s1513_s19 = scalar_lea.vmem %s2230_s17, 128  ;;  %s1708_s6 = smov [#allocation16]  }
 0x536   : > { %p1514_p3 = scmp.ne.s32.totalorder %s2230_s17, %s1513_s19  ;;  %s1517_s16 = sshll.u32 %s1708_s6, 4  ;;  %s1518_s16 = int_to_ptr.vmem [resolvable:$false] %s1517_s16 }
 0x537   : > { %s1519_s22 = scalar_lea.vmem %s1518_s16, 256  ;;  %p1520_p6 = scmp.lt.s32.totalorder %s2230_s17, %s1518_s16 }
 0x538   : > { %s1168_s3 = smul.u32 3, %s2411_s1  ;;  %p1521_p4 = scmp.lt.s32.totalorder %s1519_s22, %s1513_s19 }
 0x539   : > { %p2415_p7 = scmp.ne.s32.totalorder %s2413_s30, 0 }
 0x53a   : > { %s837_s2 = sadd.s32 %s2412_s28, %s1168_s3  ;;  %p1522_p12 = por %p1521_p4, %p1520_p6 }
 0x53b   : > { %s1076_s0 = sshll.u32 %s837_s2, 7  ;;  %p1515_p1 = pnand %p1514_p3, %p2415_p7 }
 0x53c   : > { %s839_s13 = scalar_lea.hbm %s2414_s4, %s1076_s0 }
 0x53d   : > { %p1516_p5 = pneg %p1515_p1 }
 0x53f   : > { %p1523_p0 = pnand %p1522_p12, %p1516_p5 }
 0x541   : > { %1526 = shalt.err (!%p1523_p0)
}
 0x542   : > { %s1527_s20 = scalar_lea.hbm %s839_s13, 128  ;;  %s1531_s8 = scalar_lea.hbm %s2414_s4, 768 }
 0x543   : > { %p1528_p11 = scmp.ne.s32.totalorder %s839_s13, %s1527_s20  ;;  %p1532_p13 = scmp.lt.u32.totalorder %s839_s13, %s2414_s4 }
 0x544   : > { %p1533_p9 = scmp.lt.u32.totalorder %s1531_s8, %s1527_s20  ;;  %p1535_p3 = scmp.lt.u32.totalorder %s1527_s20, %s839_s13 }
 0x545   : > { %p1529_p8 = pnand %p1528_p11, %p2415_p7 }
 0x546   : > { %p1534_p10 = por %p1533_p9, %p1532_p13 }
 0x547   : > { %p1530_p2 = pneg %p1529_p8 }
 0x548   : > { %p1536_p1 = por %p1535_p3, %p1534_p10 }
 0x54a   : > { %p1537_p5 = pnand %p1536_p1, %p1530_p2 }
 0x54c   : > { %1540 = shalt.err (!%p1537_p5)
}
 0x54d   : > { %1181 = dma.vmem_to_hbm [thread:$0]  (%p2415_p7), %s2230_s17, 128, %s839_s13, %s826_s18  }
 0x54e PF: > { %s2416_s3 = sld [smem:[#allocation25_spill]]  ;;  %s2417_s2 = sld [smem:[#allocation38_spill]] }
 0x54f   : > { %p1207_p6 = scmp.ge.s32.totalorder %s1691_s12, 2 }
 0x554   : > { %s853_s0 = sand.u32 1, %s2416_s3   ;;  %p2418_p4 = scmp.ne.s32.totalorder %s2417_s2, 0 }
 0x555   : > { %s854_s21 = scalar_lea.sflag [#allocation8], %s853_s0 }
 0x556   : > { %p1201_p12 = pnand %p1207_p6, %p2418_p4 }
 0x558   : > { %1626 = dma.done.wait (!%p1201_p12), %s854_s21, 128  }
 0x559   : > { %1628 = vsyncadd (!%p1201_p12), %s854_s21, 4294967168  ;;  %s29_s12 = sadd.s32 1, %s1691_s12   ;;  %s2420_s21 = sld [smem:[#allocation23_spill]] }
 0x55a   : > { %p2257_p0 = scmp.ge.s32.totalorder %s29_s12, 14   ;;  %s2421_s24 = sld [smem:[#allocation24_spill]] }
 0x55b   : > { %s2422_s30 = smov %s1987_s25  ;;  %s2423_s17 = sld [smem:[#allocation26_spill]] }
 0x55c   : > { %s2424_s13 = sld [smem:[#allocation33_spill]]  ;;  %s2425_s18 = sld [smem:[#allocation35_spill]] }
 0x55d   : > { %s2426_s19 = sld [smem:[#allocation37_spill]]  ;;  %s2428_s22 = smov %s1639_s23 }
 0x55e   : > { %s2429_s23 = smov %s1994_s7  ;;  %s2430_s25 = smov %s1651_s26 }
 0x55f   : > { %s2431_s26 = smov %s2422_s30  ;;  %s2433_s28 = smov %s1663_s29 }
 0x560   : > { %s2434_s29 = smov %s1990_s14  ;;  %s2435_s30 = smov %s1679_s9 }
 0x561   : > { %s2432_s27 = smov %s2423_s17  ;;  %s2436_s7 = smov %s1683_s10 }
 0x562   : > { %s2437_s8 = smov %s1687_s11  ;;  %s2438_s9 = smov %s2424_s13 }
 0x563   : > { %s2439_s10 = smov %s2425_s18  ;;  %s2440_s11 = smov %s2426_s19 }
 0x564   :  { %28 = sbr.rel (!%p2257_p0) target bundleno = 23 (0x17), region = 142 }
 0x56b   :  { %859 = vsyncpa [#allocation7], 1 }
 0x56c   :  { %861 = vsyncpa [#allocation7 + $0x1], 1 }
 0x56d   :  { %862 = vsyncpa [#allocation12], 1 }
 0x56e   :  { %864 = vsyncpa [#allocation12 + $0x1], 1 }
 0x56f   :  { %865 = vsyncpa [#allocation15], 1 }
 0x570   :  { %867 = vsyncpa [#allocation15 + $0x1], 1 }
 0x571   :  { %868 = vsyncpa [#allocation8], 1 }
 0x572   :  { %870 = vsyncpa [#allocation8 + $0x1], 1 }
 0x573   :  { %871 = vsyncpa [#allocation9], 1 }
 0x574   :  { %873 = vsyncpa [#allocation9 + $0x1], 1 }

</bundles_post_ra>
